<compile_context>
chip_gen: v7x
topology: tpu7x:2x2x1
jax: 0.10.0
libtpu: 0.0.40
codegen_flags: <defaults>
</compile_context>

<pallas_src>
import functools

import jax
import jax.numpy as jnp
from jax.experimental import pallas as pl
from jax.experimental.pallas import tpu as pltpu


def _temporal_block_kernel(x_ref, w1_ref, b1_ref, w2_ref, b2_ref, *rest,
                           kernel_size, dilation, pad, l_tile,
                           has_downsample, compute_dtype):
    """One (batch, time-tile) grid step.

    x_ref  : (C_in, T)          current time tile of the input
    w1_ref : (C_out, K*C_in)    tap-flattened conv1 weight (compute_dtype)
    b1_ref : (C_out, 1)         f32
    w2_ref : (C_out, K*C_out)   tap-flattened conv2 weight
    b2_ref : (C_out, 1)
    [wd_ref: (C_out, C_in), bd_ref: (C_out, 1)]  only if has_downsample
    o_ref  : (C_out, T)         f32 output tile
    x_stage: (C_in, pad+T)      VMEM: causal halo carry + current x (bf16)
    h_stage: (C_out, pad+T)     VMEM: causal halo carry + current h (bf16)
    x_cat  : (K*C_in, T)        VMEM: stacked conv1 operand
    h_cat  : (K*C_out, T)       VMEM: stacked conv2 operand
    """
    if has_downsample:
        wd_ref, bd_ref, o_ref, x_stage, h_stage, x_cat, h_cat = rest
    else:
        o_ref, x_stage, h_stage, x_cat, h_cat = rest

    c_in = x_ref.shape[0]
    c_out = o_ref.shape[0]
    t = pl.program_id(1)

    # Reset the causal halo (x[t<0] = h[t<0] = 0) at the start of each batch
    # element; otherwise it holds the previous tile's trailing `pad` columns.
    if pad > 0:
        @pl.when(t == 0)
        def _():
            x_stage[:, :pad] = jnp.zeros((c_in, pad), x_stage.dtype)
            h_stage[:, :pad] = jnp.zeros((c_out, pad), h_stage.dtype)

    # Stage the current x tile (bf16 on the MXU path; accumulation is f32).
    xb = x_ref[...].astype(compute_dtype)                       # (C_in, T)
    x_stage[:, pad:] = xb

    # ---- conv1 (dilated causal): K taps fused into a single matmul ----
    for k in range(kernel_size):                                # static unroll
        x_cat[k * c_in:(k + 1) * c_in, :] = (
            x_stage[:, k * dilation:k * dilation + l_tile])
    h = jnp.maximum(
        jnp.dot(w1_ref[...], x_cat[...], preferred_element_type=jnp.float32)
        + b1_ref[...], 0.0)
    # dropout1: identity (inference semantics)
    # TODO(synk): train-mode dropout (p=0.2) would need pltpu.prng_seed /
    # prng_random_bits with a PyTorch-matched RNG stream; not implemented.

    # ---- conv2 (dilated causal) on the restaged intermediate ----
    h_stage[:, pad:] = h.astype(compute_dtype)
    for k in range(kernel_size):
        h_cat[k * c_out:(k + 1) * c_out, :] = (
            h_stage[:, k * dilation:k * dilation + l_tile])
    out = jnp.maximum(
        jnp.dot(w2_ref[...], h_cat[...], preferred_element_type=jnp.float32)
        + b2_ref[...], 0.0)
    # dropout2: identity (inference semantics)

    # ---- residual branch + final ReLU (f32 elementwise) ----
    if has_downsample:
        res = jnp.dot(wd_ref[...], xb,
                      preferred_element_type=jnp.float32) + bd_ref[...]
    else:
        res = x_ref[...].astype(jnp.float32)                    # exact identity
    o_ref[...] = jnp.maximum(out + res, 0.0).astype(o_ref.dtype)

    # Carry the trailing `pad` time columns into the halo for the next tile.
    if pad > 0:
        x_stage[:, :pad] = x_stage[:, l_tile:]
        h_stage[:, :pad] = h_stage[:, l_tile:]


def prepare_params(params, *, kernel_size, compute_dtype=jnp.bfloat16):
    """Fold PyTorch-layout effective weights into the kernel layout.

    params: w1/w2 (C_out, C_in, K), b1/b2 (C_out,), optional wd (C_out, C_in),
            bd (C_out,).  Returns tap-flattened, compute_dtype weights and
            f32 column biases.
    """
    w1, w2 = params["w1"], params["w2"]
    c_out, c_in, k = w1.shape
    assert k == kernel_size
    prep = {
        # column k*C_in + c  <->  weight[o, c, k]  (tap-major flatten)
        "w1f": jnp.transpose(w1, (0, 2, 1)).reshape(c_out, k * c_in)
                  .astype(compute_dtype),
        "b1": params["b1"].reshape(c_out, 1).astype(jnp.float32),
        "w2f": jnp.transpose(w2, (0, 2, 1)).reshape(c_out, k * c_out)
                  .astype(compute_dtype),
        "b2": params["b2"].reshape(c_out, 1).astype(jnp.float32),
    }
    if "wd" in params:
        prep["wd"] = params["wd"].astype(compute_dtype)
        prep["bd"] = params["bd"].reshape(c_out, 1).astype(jnp.float32)
    return prep


def temporal_block_forward(x, prep, *, kernel_size, dilation, padding,
                           l_tile=512, compute_dtype=jnp.bfloat16):
    """x: (N, C_in, L) float32 -> (N, C_out, L) float32."""
    N, C_in, L = x.shape
    C_out = prep["w1f"].shape[0]
    has_downsample = "wd" in prep

    # chomp(padding) after symmetric padding == causal left pad only; output
    # length equals L only for the canonical TCN padding (stride must be 1).
    assert padding == (kernel_size - 1) * dilation, (
        "fused kernel assumes causal TCN padding = (K-1)*dilation, stride=1")
    pad = padding

    # Time tiling: lane-dense tiles (multiple of 128, or the full length).
    l_tile = min(l_tile, L)
    num_t = pl.cdiv(L, l_tile)
    Lp = num_t * l_tile
    x_in = x if Lp == L else jnp.pad(x, ((0, 0), (0, 0), (0, Lp - L)))

    kernel = functools.partial(
        _temporal_block_kernel, kernel_size=kernel_size, dilation=dilation,
        pad=pad, l_tile=l_tile, has_downsample=has_downsample,
        compute_dtype=compute_dtype)

    in_specs = [
        pl.BlockSpec((None, C_in, l_tile), lambda n, t: (n, 0, t)),       # x
        # Grid-invariant weights/biases (constant index_map => fetched once).
        # TODO(synk): single-buffer them via pipeline_mode=pl.Buffered(1) once
        # confirmed supported by the top-level TPU pipeliner (saves one VMEM
        # copy of each weight).
        pl.BlockSpec((C_out, kernel_size * C_in), lambda n, t: (0, 0)),   # w1f
        pl.BlockSpec((C_out, 1), lambda n, t: (0, 0)),                    # b1
        pl.BlockSpec((C_out, kernel_size * C_out), lambda n, t: (0, 0)),  # w2f
        pl.BlockSpec((C_out, 1), lambda n, t: (0, 0)),                    # b2
    ]
    args = [x_in, prep["w1f"], prep["b1"], prep["w2f"], prep["b2"]]
    if has_downsample:
        in_specs += [
            pl.BlockSpec((C_out, C_in), lambda n, t: (0, 0)),             # wd
            pl.BlockSpec((C_out, 1), lambda n, t: (0, 0)),                # bd
        ]
        args += [prep["wd"], prep["bd"]]

    itemsize = jnp.dtype(compute_dtype).itemsize
    # VMEM budget: double-buffered pipelined blocks + persistent scratch.
    block_bytes = (C_in * l_tile * x.dtype.itemsize              # x block
                   + C_out * l_tile * 4                          # out block
                   + C_out * kernel_size * C_in * itemsize       # w1f
                   + C_out * kernel_size * C_out * itemsize      # w2f
                   + (C_out * C_in * itemsize if has_downsample else 0)
                   + 3 * C_out * 4)                              # biases
    scratch_bytes = ((C_in + C_out) * (pad + l_tile) * itemsize
                     + kernel_size * (C_in + C_out) * l_tile * itemsize)
    vmem_limit = int(min(max(2 * block_bytes + scratch_bytes + (8 << 20),
                             32 << 20), 64 << 20))

    matmul_flops = 2 * N * Lp * (C_out * kernel_size * C_in
                                 + C_out * kernel_size * C_out
                                 + (C_out * C_in if has_downsample else 0))
    bytes_accessed = int(x_in.size * x.dtype.itemsize + N * C_out * Lp * 4
                         + sum(int(v.size) * v.dtype.itemsize
                               for v in prep.values()))

    y = pl.pallas_call(
        kernel,
        out_shape=jax.ShapeDtypeStruct((N, C_out, Lp), jnp.float32),
        grid_spec=pltpu.PrefetchScalarGridSpec(
            num_scalar_prefetch=0,
            grid=(N, num_t),
            in_specs=in_specs,
            out_specs=pl.BlockSpec((None, C_out, l_tile),
                                   lambda n, t: (n, 0, t)),
            scratch_shapes=[
                pltpu.VMEM((C_in, pad + l_tile), compute_dtype),           # x halo+tile
                pltpu.VMEM((C_out, pad + l_tile), compute_dtype),          # h halo+tile
                pltpu.VMEM((kernel_size * C_in, l_tile), compute_dtype),   # conv1 operand
                pltpu.VMEM((kernel_size * C_out, l_tile), compute_dtype),  # conv2 operand
            ],
        ),
        compiler_params=pltpu.CompilerParams(
            dimension_semantics=("parallel", "arbitrary"),
            vmem_limit_bytes=vmem_limit),
        cost_estimate=pl.CostEstimate(flops=matmul_flops, transcendentals=0,
                                      bytes_accessed=bytes_accessed),
    )(*args)
    return y if Lp == L else y[:, :, :L]


# ------------------------- parameter construction -------------------------

def init_params(key, n_inputs, n_outputs, kernel_size):
    """Deterministic synthetic params mimicking the module's shapes.

    weight_norm(Conv1d) stores (v, g) with g = ||v|| over (in, k) per output
    channel, so the effective weight is g * v / ||v|| (== v at init); we fold
    it explicitly.
    """
    ks = jax.random.split(key, 6)

    def wn_weight(k, shape):
        v = 0.01 * jax.random.normal(k, shape, jnp.float32)
        norm = jnp.sqrt(jnp.sum(v * v, axis=(1, 2), keepdims=True))
        g = norm
        return g * v / norm

    params = {
        "w1": wn_weight(ks[0], (n_outputs, n_inputs, kernel_size)),
        "b1": 0.01 * jax.random.normal(ks[1], (n_outputs,), jnp.float32),
        "w2": wn_weight(ks[2], (n_outputs, n_outputs, kernel_size)),
        "b2": 0.01 * jax.random.normal(ks[3], (n_outputs,), jnp.float32),
    }
    if n_inputs != n_outputs:
        params["wd"] = 0.01 * jax.random.normal(
            ks[4], (n_outputs, n_inputs), jnp.float32)           # 1x1 conv
        params["bd"] = 0.01 * jax.random.normal(ks[5], (n_outputs,), jnp.float32)
    return params


# ------------------------------ JAX reference ------------------------------

def reference_forward(x, prep, *, kernel_size, dilation,
                      compute_dtype=jnp.bfloat16):
    """Pure-JAX reference that mirrors the kernel's bf16 quantization points."""
    N, C_in, L = x.shape
    C_out = prep["w1f"].shape[0]
    pad = (kernel_size - 1) * dilation
    K = kernel_size

    def causal_conv(inp, w_flat, b, cin):
        w = w_flat.astype(jnp.float32).reshape(C_out, K, cin)
        xp = jnp.pad(inp, ((0, 0), (0, 0), (pad, 0)))
        acc = jnp.zeros((N, C_out, L), jnp.float32)
        for k in range(K):
            acc = acc + jnp.einsum("oc,ncl->nol", w[:, k, :],
                                   xp[:, :, k * dilation: k * dilation + L])
        return acc + b.reshape(1, C_out, 1)

    xq = x.astype(compute_dtype).astype(jnp.float32)
    h = jnp.maximum(causal_conv(xq, prep["w1f"], prep["b1"], C_in), 0.0)
    hq = h.astype(compute_dtype).astype(jnp.float32)
    out = jnp.maximum(causal_conv(hq, prep["w2f"], prep["b2"], C_out), 0.0)
    if "wd" in prep:
        res = (jnp.einsum("oc,ncl->nol", prep["wd"].astype(jnp.float32), xq)
               + prep["bd"].reshape(1, C_out, 1))
    else:
        res = x
    return jnp.maximum(out + res, 0.0)


if __name__ == "__main__":
    key = jax.random.PRNGKey(0)

    def run_case(name, k, *, N, c_in, c_out, L, kernel_size, dilation, l_tile):
        padding = (kernel_size - 1) * dilation
        kx, kp = jax.random.split(k)
        x = jax.random.normal(kx, (N, c_in, L), jnp.float32)
        params = init_params(kp, c_in, c_out, kernel_size)
        prep = prepare_params(params, kernel_size=kernel_size)

        y = temporal_block_forward(x, prep, kernel_size=kernel_size,
                                   dilation=dilation, padding=padding,
                                   l_tile=l_tile)
        y = jax.block_until_ready(y)

        y_ref = reference_forward(x, prep, kernel_size=kernel_size,
                                  dilation=dilation)
        assert y.shape == (N, c_out, L)
        err = float(jnp.max(jnp.abs(y - y_ref)))
        assert jnp.allclose(y, y_ref, rtol=1e-3, atol=1e-3), (
            f"{name}: max abs err {err}")

    k1, k2 = jax.random.split(key)
    # Small single-tile case with a 1x1 downsample residual (C_in != C_out).
    run_case("downsample", k1, N=2, c_in=4, c_out=8, L=16,
             kernel_size=3, dilation=2, l_tile=512)
    # Multi-tile case exercising the causal halo carry (identity residual).
    run_case("tiled_carry", k2, N=2, c_in=8, c_out=8, L=256,
             kernel_size=3, dilation=2, l_tile=128)

    print("KERNEL_OK")
</pallas_src>

<mosaic_0001>
module attributes {stable_mosaic.version = 11 : i64} {
  func.func @_temporal_block_kernel(%arg0: i32, %arg1: i32, %arg2: memref<1x4x16xf32, #tpu.memory_space<vmem>>, %arg3: memref<8x12xbf16, #tpu.memory_space<vmem>>, %arg4: memref<8x1xf32, #tpu.memory_space<vmem>>, %arg5: memref<8x24xbf16, #tpu.memory_space<vmem>>, %arg6: memref<8x1xf32, #tpu.memory_space<vmem>>, %arg7: memref<8x4xbf16, #tpu.memory_space<vmem>>, %arg8: memref<8x1xf32, #tpu.memory_space<vmem>>, %arg9: memref<1x8x16xf32, #tpu.memory_space<vmem>>, %arg10: memref<4x20xbf16, #tpu.memory_space<vmem>>, %arg11: memref<8x20xbf16, #tpu.memory_space<vmem>>, %arg12: memref<12x16xbf16, #tpu.memory_space<vmem>>, %arg13: memref<24x16xbf16, #tpu.memory_space<vmem>>) attributes {dimension_semantics = [#tpu.dimension_semantics<parallel>, #tpu.dimension_semantics<arbitrary>], iteration_bounds = array<i64: 2, 1>, scalar_prefetch = 0 : i64, scratch_operands = 4 : i64, tpu.core_type = #tpu.core_type<tc>, window_params = [{transform_indices = @transform_0, window_bounds = array<i64: 1, 4, 16>}, {pipeline_mode = #tpu.pipeline_mode<synchronous>, transform_indices = @transform_1, window_bounds = array<i64: 8, 12>}, {pipeline_mode = #tpu.pipeline_mode<synchronous>, transform_indices = @transform_2, window_bounds = array<i64: 8, 1>}, {pipeline_mode = #tpu.pipeline_mode<synchronous>, transform_indices = @transform_3, window_bounds = array<i64: 8, 24>}, {pipeline_mode = #tpu.pipeline_mode<synchronous>, transform_indices = @transform_4, window_bounds = array<i64: 8, 1>}, {pipeline_mode = #tpu.pipeline_mode<synchronous>, transform_indices = @transform_5, window_bounds = array<i64: 8, 4>}, {pipeline_mode = #tpu.pipeline_mode<synchronous>, transform_indices = @transform_6, window_bounds = array<i64: 8, 1>}, {transform_indices = @transform_7, window_bounds = array<i64: 1, 8, 16>}]} {
    %c0_i32 = arith.constant 0 : i32
    %0 = arith.cmpi eq, %arg1, %c0_i32 : i32
    %1 = arith.extui %0 : i1 to i32
    %c0_i32_0 = arith.constant 0 : i32
    %2 = arith.cmpi ne, %1, %c0_i32_0 : i32
    scf.if %2 {
      %cst_59 = arith.constant 0.000000e+00 : bf16
      %52 = vector.broadcast %cst_59 : bf16 to vector<4x4xbf16>
      %c0_60 = arith.constant 0 : index
      %c0_61 = arith.constant 0 : index
      %53 = vector.load %arg10[%c0_60, %c0_61] : memref<4x20xbf16, #tpu.memory_space<vmem>>, vector<4x4xbf16>
      tpu.vector_store %arg10[%c0_60, %c0_61], %52 {strides = array<i32>} : memref<4x20xbf16, #tpu.memory_space<vmem>>, vector<4x4xbf16>,
      %cst_62 = arith.constant 0.000000e+00 : bf16
      %54 = vector.broadcast %cst_62 : bf16 to vector<8x4xbf16>
      %c0_63 = arith.constant 0 : index
      %c0_64 = arith.constant 0 : index
      %55 = vector.load %arg11[%c0_63, %c0_64] : memref<8x20xbf16, #tpu.memory_space<vmem>>, vector<8x4xbf16>
      tpu.vector_store %arg11[%c0_63, %c0_64], %54 {strides = array<i32>} : memref<8x20xbf16, #tpu.memory_space<vmem>>, vector<8x4xbf16>,
    } else {
    }
    %c0 = arith.constant 0 : index
    %c0_1 = arith.constant 0 : index
    %c0_2 = arith.constant 0 : index
    %3 = vector.load %arg2[%c0, %c0_1, %c0_2] : memref<1x4x16xf32, #tpu.memory_space<vmem>>, vector<1x4x16xf32>
    %4 = vector.shape_cast %3 : vector<1x4x16xf32> to vector<4x16xf32>
    %5 = arith.truncf %4 : vector<4x16xf32> to vector<4x16xbf16>
    %c0_3 = arith.constant 0 : index
    %c4 = arith.constant 4 : index
    %6 = vector.load %arg10[%c0_3, %c4] : memref<4x20xbf16, #tpu.memory_space<vmem>>, vector<4x16xbf16>
    tpu.vector_store %arg10[%c0_3, %c4], %5 {strides = array<i32>} : memref<4x20xbf16, #tpu.memory_space<vmem>>, vector<4x16xbf16>,
    %c0_4 = arith.constant 0 : index
    %c0_5 = arith.constant 0 : index
    %7 = vector.load %arg10[%c0_4, %c0_5] : memref<4x20xbf16, #tpu.memory_space<vmem>>, vector<4x16xbf16>
    %c0_6 = arith.constant 0 : index
    %c0_7 = arith.constant 0 : index
    %8 = vector.load %arg12[%c0_6, %c0_7] : memref<12x16xbf16, #tpu.memory_space<vmem>>, vector<4x16xbf16>
    tpu.vector_store %arg12[%c0_6, %c0_7], %7 {strides = array<i32>} : memref<12x16xbf16, #tpu.memory_space<vmem>>, vector<4x16xbf16>,
    %c0_8 = arith.constant 0 : index
    %c2 = arith.constant 2 : index
    %9 = vector.load %arg10[%c0_8, %c2] : memref<4x20xbf16, #tpu.memory_space<vmem>>, vector<4x16xbf16>
    %c4_9 = arith.constant 4 : index
    %c0_10 = arith.constant 0 : index
    %10 = vector.load %arg12[%c4_9, %c0_10] : memref<12x16xbf16, #tpu.memory_space<vmem>>, vector<4x16xbf16>
    tpu.vector_store %arg12[%c4_9, %c0_10], %9 {strides = array<i32>} : memref<12x16xbf16, #tpu.memory_space<vmem>>, vector<4x16xbf16>,
    %c0_11 = arith.constant 0 : index
    %c4_12 = arith.constant 4 : index
    %11 = vector.load %arg10[%c0_11, %c4_12] : memref<4x20xbf16, #tpu.memory_space<vmem>>, vector<4x16xbf16>
    %c8 = arith.constant 8 : index
    %c0_13 = arith.constant 0 : index
    %12 = vector.load %arg12[%c8, %c0_13] : memref<12x16xbf16, #tpu.memory_space<vmem>>, vector<4x16xbf16>
    tpu.vector_store %arg12[%c8, %c0_13], %11 {strides = array<i32>} : memref<12x16xbf16, #tpu.memory_space<vmem>>, vector<4x16xbf16>,
    %c0_14 = arith.constant 0 : index
    %c0_15 = arith.constant 0 : index
    %13 = vector.load %arg3[%c0_14, %c0_15] : memref<8x12xbf16, #tpu.memory_space<vmem>>, vector<8x12xbf16>
    %c0_16 = arith.constant 0 : index
    %c0_17 = arith.constant 0 : index
    %14 = vector.load %arg12[%c0_16, %c0_17] : memref<12x16xbf16, #tpu.memory_space<vmem>>, vector<12x16xbf16>
    %cst = arith.constant dense<0.000000e+00> : vector<8x16xf32>
    %15 = tpu.matmul %13, %14, %cst {dimension_numbers = #tpu.dot_dimension_numbers<[1], [0], [0], [1], [0, 0, 1, 1], [], []>} : vector<8x12xbf16>, vector<12x16xbf16>, vector<8x16xf32> -> vector<8x16xf32>
    %c0_18 = arith.constant 0 : index
    %c0_19 = arith.constant 0 : index
    %16 = vector.load %arg4[%c0_18, %c0_19] : memref<8x1xf32, #tpu.memory_space<vmem>>, vector<8x1xf32>
    %17 = vector.broadcast %16 : vector<8x1xf32> to vector<8x16xf32>
    %18 = arith.addf %15, %17 : vector<8x16xf32>
    %cst_20 = arith.constant 0.000000e+00 : f32
    %19 = vector.broadcast %cst_20 : f32 to vector<8x16xf32>
    %20 = arith.maximumf %18, %19 : vector<8x16xf32>
    %21 = arith.truncf %20 : vector<8x16xf32> to vector<8x16xbf16>
    %c0_21 = arith.constant 0 : index
    %c4_22 = arith.constant 4 : index
    %22 = vector.load %arg11[%c0_21, %c4_22] : memref<8x20xbf16, #tpu.memory_space<vmem>>, vector<8x16xbf16>
    tpu.vector_store %arg11[%c0_21, %c4_22], %21 {strides = array<i32>} : memref<8x20xbf16, #tpu.memory_space<vmem>>, vector<8x16xbf16>,
    %c0_23 = arith.constant 0 : index
    %c0_24 = arith.constant 0 : index
    %23 = vector.load %arg11[%c0_23, %c0_24] : memref<8x20xbf16, #tpu.memory_space<vmem>>, vector<8x16xbf16>
    %c0_25 = arith.constant 0 : index
    %c0_26 = arith.constant 0 : index
    %24 = vector.load %arg13[%c0_25, %c0_26] : memref<24x16xbf16, #tpu.memory_space<vmem>>, vector<8x16xbf16>
    tpu.vector_store %arg13[%c0_25, %c0_26], %23 {strides = array<i32>} : memref<24x16xbf16, #tpu.memory_space<vmem>>, vector<8x16xbf16>,
    %c0_27 = arith.constant 0 : index
    %c2_28 = arith.constant 2 : index
    %25 = vector.load %arg11[%c0_27, %c2_28] : memref<8x20xbf16, #tpu.memory_space<vmem>>, vector<8x16xbf16>
    %c8_29 = arith.constant 8 : index
    %c0_30 = arith.constant 0 : index
    %26 = vector.load %arg13[%c8_29, %c0_30] : memref<24x16xbf16, #tpu.memory_space<vmem>>, vector<8x16xbf16>
    tpu.vector_store %arg13[%c8_29, %c0_30], %25 {strides = array<i32>} : memref<24x16xbf16, #tpu.memory_space<vmem>>, vector<8x16xbf16>,
    %c0_31 = arith.constant 0 : index
    %c4_32 = arith.constant 4 : index
    %27 = vector.load %arg11[%c0_31, %c4_32] : memref<8x20xbf16, #tpu.memory_space<vmem>>, vector<8x16xbf16>
    %c16 = arith.constant 16 : index
    %c0_33 = arith.constant 0 : index
    %28 = vector.load %arg13[%c16, %c0_33] : memref<24x16xbf16, #tpu.memory_space<vmem>>, vector<8x16xbf16>
    tpu.vector_store %arg13[%c16, %c0_33], %27 {strides = array<i32>} : memref<24x16xbf16, #tpu.memory_space<vmem>>, vector<8x16xbf16>,
    %c0_34 = arith.constant 0 : index
    %c0_35 = arith.constant 0 : index
    %29 = vector.load %arg5[%c0_34, %c0_35] : memref<8x24xbf16, #tpu.memory_space<vmem>>, vector<8x24xbf16>
    %c0_36 = arith.constant 0 : index
    %c0_37 = arith.constant 0 : index
    %30 = vector.load %arg13[%c0_36, %c0_37] : memref<24x16xbf16, #tpu.memory_space<vmem>>, vector<24x16xbf16>
    %cst_38 = arith.constant dense<0.000000e+00> : vector<8x16xf32>
    %31 = tpu.matmul %29, %30, %cst_38 {dimension_numbers = #tpu.dot_dimension_numbers<[1], [0], [0], [1], [0, 0, 1, 1], [], []>} : vector<8x24xbf16>, vector<24x16xbf16>, vector<8x16xf32> -> vector<8x16xf32>
    %c0_39 = arith.constant 0 : index
    %c0_40 = arith.constant 0 : index
    %32 = vector.load %arg6[%c0_39, %c0_40] : memref<8x1xf32, #tpu.memory_space<vmem>>, vector<8x1xf32>
    %33 = vector.broadcast %32 : vector<8x1xf32> to vector<8x16xf32>
    %34 = arith.addf %31, %33 : vector<8x16xf32>
    %cst_41 = arith.constant 0.000000e+00 : f32
    %35 = vector.broadcast %cst_41 : f32 to vector<8x16xf32>
    %36 = arith.maximumf %34, %35 : vector<8x16xf32>
    %c0_42 = arith.constant 0 : index
    %c0_43 = arith.constant 0 : index
    %37 = vector.load %arg7[%c0_42, %c0_43] : memref<8x4xbf16, #tpu.memory_space<vmem>>, vector<8x4xbf16>
    %cst_44 = arith.constant dense<0.000000e+00> : vector<8x16xf32>
    %38 = tpu.matmul %37, %5, %cst_44 {dimension_numbers = #tpu.dot_dimension_numbers<[1], [0], [0], [1], [0, 0, 1, 1], [], []>} : vector<8x4xbf16>, vector<4x16xbf16>, vector<8x16xf32> -> vector<8x16xf32>
    %c0_45 = arith.constant 0 : index
    %c0_46 = arith.constant 0 : index
    %39 = vector.load %arg8[%c0_45, %c0_46] : memref<8x1xf32, #tpu.memory_space<vmem>>, vector<8x1xf32>
    %40 = vector.broadcast %39 : vector<8x1xf32> to vector<8x16xf32>
    %41 = arith.addf %38, %40 : vector<8x16xf32>
    %42 = arith.addf %36, %41 : vector<8x16xf32>
    %cst_47 = arith.constant 0.000000e+00 : f32
    %43 = vector.broadcast %cst_47 : f32 to vector<8x16xf32>
    %44 = arith.maximumf %42, %43 : vector<8x16xf32>
    %c0_48 = arith.constant 0 : index
    %c0_49 = arith.constant 0 : index
    %c0_50 = arith.constant 0 : index
    %45 = vector.load %arg9[%c0_48, %c0_49, %c0_50] : memref<1x8x16xf32, #tpu.memory_space<vmem>>, vector<1x8x16xf32>
    %46 = vector.shape_cast %45 : vector<1x8x16xf32> to vector<8x16xf32>
    %47 = vector.shape_cast %44 : vector<8x16xf32> to vector<1x8x16xf32>
    tpu.vector_store %arg9[%c0_48, %c0_49, %c0_50], %47 {strides = array<i32>} : memref<1x8x16xf32, #tpu.memory_space<vmem>>, vector<1x8x16xf32>,
    %c0_51 = arith.constant 0 : index
    %c16_52 = arith.constant 16 : index
    %48 = vector.load %arg10[%c0_51, %c16_52] : memref<4x20xbf16, #tpu.memory_space<vmem>>, vector<4x4xbf16>
    %c0_53 = arith.constant 0 : index
    %c0_54 = arith.constant 0 : index
    %49 = vector.load %arg10[%c0_53, %c0_54] : memref<4x20xbf16, #tpu.memory_space<vmem>>, vector<4x4xbf16>
    tpu.vector_store %arg10[%c0_53, %c0_54], %48 {strides = array<i32>} : memref<4x20xbf16, #tpu.memory_space<vmem>>, vector<4x4xbf16>,
    %c0_55 = arith.constant 0 : index
    %c16_56 = arith.constant 16 : index
    %50 = vector.load %arg11[%c0_55, %c16_56] : memref<8x20xbf16, #tpu.memory_space<vmem>>, vector<8x4xbf16>
    %c0_57 = arith.constant 0 : index
    %c0_58 = arith.constant 0 : index
    %51 = vector.load %arg11[%c0_57, %c0_58] : memref<8x20xbf16, #tpu.memory_space<vmem>>, vector<8x4xbf16>
    tpu.vector_store %arg11[%c0_57, %c0_58], %50 {strides = array<i32>} : memref<8x20xbf16, #tpu.memory_space<vmem>>, vector<8x4xbf16>,
    return
  }
  func.func @transform_0(%arg0: i32, %arg1: i32) -> (i32, i32, i32) {
    %c0_i32 = arith.constant 0 : i32
    %c0_i32_0 = arith.constant 0 : i32
    return %arg0, %c0_i32, %arg1 : i32, i32, i32
  }
  func.func @transform_1(%arg0: i32, %arg1: i32) -> (i32, i32) {
    %c0_i32 = arith.constant 0 : i32
    %c0_i32_0 = arith.constant 0 : i32
    %c0_i32_1 = arith.constant 0 : i32
    return %c0_i32, %c0_i32_0 : i32, i32
  }
  func.func @transform_2(%arg0: i32, %arg1: i32) -> (i32, i32) {
    %c0_i32 = arith.constant 0 : i32
    %c0_i32_0 = arith.constant 0 : i32
    %c0_i32_1 = arith.constant 0 : i32
    return %c0_i32, %c0_i32_0 : i32, i32
  }
  func.func @transform_3(%arg0: i32, %arg1: i32) -> (i32, i32) {
    %c0_i32 = arith.constant 0 : i32
    %c0_i32_0 = arith.constant 0 : i32
    %c0_i32_1 = arith.constant 0 : i32
    return %c0_i32, %c0_i32_0 : i32, i32
  }
  func.func @transform_4(%arg0: i32, %arg1: i32) -> (i32, i32) {
    %c0_i32 = arith.constant 0 : i32
    %c0_i32_0 = arith.constant 0 : i32
    %c0_i32_1 = arith.constant 0 : i32
    return %c0_i32, %c0_i32_0 : i32, i32
  }
  func.func @transform_5(%arg0: i32, %arg1: i32) -> (i32, i32) {
    %c0_i32 = arith.constant 0 : i32
    %c0_i32_0 = arith.constant 0 : i32
    %c0_i32_1 = arith.constant 0 : i32
    return %c0_i32, %c0_i32_0 : i32, i32
  }
  func.func @transform_6(%arg0: i32, %arg1: i32) -> (i32, i32) {
    %c0_i32 = arith.constant 0 : i32
    %c0_i32_0 = arith.constant 0 : i32
    %c0_i32_1 = arith.constant 0 : i32
    return %c0_i32, %c0_i32_0 : i32, i32
  }
  func.func @transform_7(%arg0: i32, %arg1: i32) -> (i32, i32, i32) {
    %c0_i32 = arith.constant 0 : i32
    %c0_i32_0 = arith.constant 0 : i32
    return %arg0, %c0_i32, %arg1 : i32, i32, i32
  }
}

</mosaic_0001>

<bundles_post_ra>
// kernel: tpu_custom_call.1
= control target key start
LH: loop header
LB: loop body
LE: loop exit
PB: predicated region body
PF: predicated region fallthrough
CT: control target
= control target key end

     0   :  { %12 = vsyncpa [#allocation7], 0  ;;  %s1068_s0 = inlined_call_operand.vmem [shape: f32[2,4,16], index: 0, kind: input, shape index: {}]   ;;  %s1069_s1 = inlined_call_operand.vmem [shape: bf16[8,12], index: 1, kind: input, shape index: {}]   ;;  %s1070_s2 = inlined_call_operand.vmem [shape: f32[8,1], index: 2, kind: input, shape index: {}]   ;;  %s1071_s3 = inlined_call_operand.vmem [shape: bf16[8,24], index: 3, kind: input, shape index: {}]   ;;  %s1072_s4 = inlined_call_operand.vmem [shape: f32[8,1], index: 4, kind: input, shape index: {}]   ;;  %s1073_s5 = inlined_call_operand.vmem [shape: bf16[8,4], index: 5, kind: input, shape index: {}]   ;;  %s1074_s6 = inlined_call_operand.vmem [shape: f32[8,1], index: 6, kind: input, shape index: {}]   ;;  %s1075_s7 = inlined_call_operand.hbm [shape: f32[2,8,16], index: 7, kind: output, shape index: {}]  }
   0x1   :  { %14 = vsyncpa [#allocation7 + $0x1], 0  ;;  %s913_s24 = smov 0   ;;  %s915_s25 = smov 0  }
   0x2   :  { %s917_s26 = smov 0   ;;  %s919_s27 = smov 0  }
   0x3   :  { %s921_s28 = smov 0   ;;  %s923_s29 = smov 0  }
   0x4 LB: > { %s668_s30 = sadd.s32 4294967295, %s862_s29   ;;  %s669_s8 = sadd.s32 4294967294, %s862_s29   ;;  %s862_s29 = sphi %s923_s29, %s20_s29   ;;  %s858_s28 = sphi %s921_s28, %s1082_s28   ;;  %s854_s27 = sphi %s919_s27, %s1081_s27   ;;  %s850_s26 = sphi %s917_s26, %s1080_s26   ;;  %s846_s25 = sphi %s915_s25, %s1079_s25   ;;  %s842_s24 = sphi %s913_s24, %s1078_s24  }
   0x5   : > { %s32_s9 = sadd.s32 1, %s858_s28  ;;  %s195_s10 = sadd.s32 1, %s850_s26 }
   0x6   : > { %p34_p0 = scmp.ge.s32.totalorder %s32_s9, 2  ;;  %p205_p1 = scmp.ne.s32.totalorder %s850_s26, %s846_s25 }
   0x7   : > { %p206_p2 = scmp.eq.s32.totalorder %s668_s30, 1  ;;  %p211_p3 = scmp.ne.s32.totalorder %s846_s25, %s842_s24 }
   0x8   : > { %s1084_s9 = smov (%p34_p0, %s32_s9), 0  ;;  %p212_p5 = scmp.eq.s32.totalorder %s669_s8, 1 }
   0x9   : > { %p953_p4 = por %p206_p2, %p205_p1  ;;  %s190_s12 = ssub.s32 %s858_s28, %s1084_s9 }
   0xa   : > { %p672_p6 = scmp.ge.s32.totalorder %s862_s29, 1  ;;  %p193_p7 = scmp.eq.s32.totalorder %s190_s12, 0 }
   0xb   : > { %p960_p8 = por %p212_p5, %p211_p3  ;;  %p258_p9 = scmp.lt.s32.totalorder %s862_s29, 3 }
   0xc   : > { %s966_s14 = scalar_select %p193_p7, %s850_s26, %s195_s10  }
   0xd   : > { %p259_p10 = pnand %p672_p6, %p258_p9 }
   0xe   : > { %p292_p11 = scmp.lt.s32.totalorder (!%p259_p10), %s854_s27, 1  ;;  %v314_v0 = vlaneseq (!%p259_p10)  ;;  %vm304_vm0 = vcmask (!%p259_p10), 25600   ;;  %v864_v1 = vmov (!%p259_p10), 1983009808   ;;  %v865_v3 = vmov (!%p259_p10), 0   ;;  %s866_s20 = smov (!%p259_p10), 4  }
   0xf   : > { %262 = sbr.rel (%p259_p10) target bundleno = 990 (0x3de), region = 48  ;;  %v312_v2 = vunpack.c.l.s4 (!%p259_p10), %v864_v1  ;;  %305 = vst.msk [vmem:[#allocation2] sm:$0x3] (!%p259_p10), %vm304_vm0, %v865_v3  ;;  %778 = vset.pattern.permute.xlu1 (!%p259_p10), %v865_v3  ;;  %779 = vset.pattern.permute.xlu0 (!%p259_p10), %v865_v3  ;;  %vm321_vm1 = vcmask (!%p259_p10), 156704   ;;  %v867_v11 = vmov (!%p259_p10), 0.0   ;;  %vm324_vm2 = vcmask (!%p259_p10), 123904  }
  0x10   : > { %v315_v4 = vshrl.u32 (!%p259_p10), %v314_v0, 7  ;;  %695 = vmatprep.subr.bf16.mxu0 (!%p259_p10), %v867_v11  ;;  %701 = vmatprep.subr.bf16.mxu1 (!%p259_p10), %v867_v11  ;;  %s868_s21 = smov (!%p259_p10), 124   ;;  %vm869_vm3 = vmmov (!%p259_p10), 0   ;;  %s870_s22 = smov (!%p259_p10), 126   ;;  %v357_v16 = vld [vmem:[%s1070_s2] sm:$0xff] (!%p259_p10)  ;;  %vm339_vm4 = vcmask (!%p259_p10), 125954  }
  0x11   : > { %v313_v5 = vunpack.c.0.s8 (!%p259_p10), %v312_v2  ;;  %697 = vmatprep.mubr.msk.bf16.mxu0 (!%p259_p10), %vm869_vm3, %v867_v11  ;;  %705 = vmatprep.mubr.msk.bf16.mxu1 (!%p259_p10), %vm869_vm3, %v867_v11  ;;  %vm372_vm5 = vcmask (!%p259_p10), 1045504   ;;  %v354_v21 = vld [vmem:[%s1069_s1] sm:$0xf] (!%p259_p10)  ;;  %vm368_vm6 = vcmask (!%p259_p10), 97280   ;;  %vm306_vm7 = vcmask (!%p259_p10), 27648   ;;  %s871_s18 = smov (!%p259_p10), 112  }
  0x12   : > { %307 = vst.msk [vmem:[#allocation3] sm:$0xf] (!%p259_p10), %vm306_vm7, %v865_v3  ;;  %vm424_vm8 = vcmask (!%p259_p10), 158752   ;;  %vm520_vm9 = vcmask (!%p259_p10), 1041408   ;;  %vm427_vm10 = vcmask (!%p259_p10), 125952   ;;  %vm516_vm11 = vcmask (!%p259_p10), 31744  }
  0x13   : > { %v316_v6 = vsub.s32 (!%p259_p10), %v313_v5, %v315_v4  ;;  %v509_v35 = vld [vmem:[%s1073_s5] sm:$0xf] (!%p259_p10)  ;;  %vm464_vm12 = vcmask (!%p259_p10), 1043456   ;;  %vm460_vm13 = vcmask (!%p259_p10), 195584   ;;  %s289_s23 = sand.u32 (!%p259_p10), 1, %s846_s25   ;;  %s684_s8 = sshll.u32 (!%p259_p10), %s854_s27, 7 }
  0x14   : > { %v445_v36 = vld [vmem:[%s1072_s4] sm:$0xff] (!%p259_p10)  ;;  %s673_s30 = sshll.u32 (!%p259_p10), %s289_s23, 3  ;;  %vm566_vm14 = vcmask (!%p259_p10), 130048   ;;  %s1021_s17 = scalar_lea.hbm (!%p259_p10), %s1075_s7, %s684_s8 }
  0x15   : > { %v510_v39 = vld [vmem:[%s1074_s6] sm:$0xff] (!%p259_p10)  ;;  %s291_s10 = scalar_lea.vmem (!%p259_p10), [#allocation6], %s673_s30 }
  0x16   : > { %s293_s15 = scalar_select %p292_p11, %s854_s27, 1  ;;  %v441_v45 = vld [vmem:[%s1071_s3] sm:$0xf] }
  0x17   : > { %s597_s12 = sshll.u32 %s291_s10, 4  ;;  %s872_s27 = smov [#allocation6]   ;;  %s1023_s12 = int_to_ptr.vmem [resolvable:$true] %s597_s12 }
  0x18   : > { %s674_s16 = sshll.u32 %s293_s15, 2 }
  0x19   : > { %s298_s19 = scalar_lea.vmem %s1068_s0, %s674_s16 }
  0x1a   : > { %v308_v7 = vld [vmem:[%s298_s19] sm:$0xf]  ;;  %s784_s19 = scalar_lea.vmem %s1023_s12, 128 }
  0x1b   : > { %v309_v8 = vpack.c.bf16 %v308_v7, %v308_v7  ;;  %p785_p12 = scmp.ne.s32.totalorder %s1023_s12, %s784_s19 }
  0x1d   : > { %v317_v9 = vrot.slane %v309_v8, %v316_v6  ;;  %v522_v31 = vsel %vm520_vm9, %v309_v8, 0  ;;  %p786_p13 = pnand %p785_p12, %p953_p4 }
  0x1f   : > { %318 = vrot.lane.b32.xlu0 %v317_v9, %s866_s20  ;;  %p787_p0 = pneg %p786_p13 }
  0x91   : > { %v319_v10 = vpop.permute.xlu0 %318 }
  0x92   : > { %322 = vst.msk [vmem:[#allocation2] sm:$0x3] %vm321_vm1, %v319_v10 }
  0x99   : > { %v675_v12 = vld.sshfl [vmem:[#allocation2] sm:$0x3 pattern:$0x76325410] }
  0x9a   : > { %350 = vrot.lane.b32.xlu1 %v675_v12, %s868_s21  ;;  %v780_v13 = vld [vmem:[#allocation2] ss:$0 sps:$4 sm:$0x33]  }
  0x9b   : > { %v323_v14 = vld [vmem:[#allocation2] sm:$0x3]  ;;  %v335_v15 = vrot.slane %v780_v13, %v316_v6 }
  0x9c   : > { %325 = vst.msk [vmem:[#allocation4] sm:$0x3] %vm324_vm2, %v323_v14  ;;  %v568_v37 = vld [vmem:[#allocation2] sm:$0x3] }
  0x9d   : > { %336 = vrot.lane.b32.xlu0 %v335_v15, %s870_s22 }
  0x9e   : > { %360 = vperm.xlu1 %778, %v357_v16  }
 0x10c   : > { %v351_v17 = vpop.permute.xlu1 %350 }
 0x10d   : > { %353 = vst.msk [vmem:[#allocation4 + $0x4] sm:$0x3] %vm324_vm2, %v351_v17 }
 0x10f   : > { %v337_v18 = vpop.permute.xlu0 %336 }
 0x110   : > { %340 = vst.msk [vmem:[#allocation4] sm:$0xc] %vm339_vm4, %v337_v18 }
 0x117   : > { %v781_v19 = vld [vmem:[#allocation4] sm:$0x3f]  }
 0x118   : > { %v374_v20 = vsel %vm372_vm5, %v781_v19, 0 }
 0x119   : > { %696 = vmatpush3.bf16.msra.mxu0 %v374_v20 }
 0x11a   : > { %709 = vmatprep.subr.bf16.mxu0 %v867_v11 }
 0x11c   : > { %698 = vmatmul.mubr.msk.bf16.vlgmr.msra.gmra.mrb[0].mxu0 %vm368_vm6, %v354_v21 }
 0x11d   : > { %711 = vmatprep.mubr.msk.bf16.mxu0 %vm869_vm3, %v867_v11  ;;  %v361_v22 = vpop.permute.xlu1 %360  ;;  %710 = vmatpush3.bf16.msra.mxu0 %v522_v31 }
 0x124   : > { %712 = vmatmul.mubr.msk.bf16.vlgmr.msra.gmra.mrb[4].mxu0 %vm516_vm11, %v509_v35 }
 0x1ef   : > { %v410_v23 = vpop.f32.mrb[0].mxu0 }
 0x1f0   : > { %v411_v24 = vadd.f32 %v410_v23, %v361_v22  ;;  %v699_v25 = vpop.f32.mrb[1].mxu0 }
 0x1f1   : > { %v413_v26 = vpop.f32.mrb[2].mxu0 }
 0x1f2   : > { %v416_v27 = vmax.f32 %v411_v24, 0.0  ;;  %v700_v28 = vpop.f32.mrb[3].mxu0 }
 0x1f4   : > { %v687_v29 = vpack.c.bf16 %v416_v27, %v416_v27 }
 0x1f6   : > { %421 = vrot.lane.b32.xlu0 %v687_v29, %s866_s20  ;;  %s788_s20 = sshll.u32 %s872_s27, 4  ;;  %s789_s20 = int_to_ptr.vmem [resolvable:$false] %s788_s20 }
 0x1f7   : > { %v558_v49 = vpop.f32.mrb[4].mxu0  ;;  %p791_p1 = scmp.lt.s32.totalorder %s1023_s12, %s789_s20 }
 0x1f8   : > { %v713_v50 = vpop.f32.mrb[5].mxu0 }
 0x1f9   : > { %v561_v51 = vpop.f32.mrb[6].mxu0 }
 0x1fa   : > { %v714_v52 = vpop.f32.mrb[7].mxu0 }
 0x268   : > { %v422_v30 = vpop.permute.xlu0 %421 }
 0x269   : > { %425 = vst.msk [vmem:[#allocation3] sm:$0xf] %vm424_vm8, %v422_v30 }
 0x270   : > { %v435_v32 = vld [vmem:[#allocation3] sm:$0xf] }
 0x271   : > { %v429_v33 = vld [vmem:[#allocation3] sm:$0xf]  ;;  %437 = vrot.lane.b32.xlu0 %v435_v32, %s868_s21  ;;  %s790_s21 = scalar_lea.vmem %s789_s20, 256 }
 0x272   : > { %431 = vrot.lane.b32.xlu1 %v429_v33, %s870_s22  ;;  %v426_v34 = vld [vmem:[#allocation3] sm:$0xf]  ;;  %p792_p2 = scmp.lt.s32.totalorder %s790_s21, %s784_s19 }
 0x273   : > { %428 = vst.msk [vmem:[#allocation5] sm:$0xf] %vm427_vm10, %v426_v34  ;;  %v575_v38 = vld [vmem:[#allocation3] sm:$0xf] }
 0x274   : > { %p793_p3 = por %p792_p2, %p791_p1 }
 0x275   : > { %513 = vperm.xlu0 %779, %v510_v39  }
 0x276   : > { %448 = vperm.xlu1 %778, %v445_v36   ;;  %p794_p5 = pnand %p793_p3, %p787_p0 }
 0x27a   : > { %570 = vrot.lane.b32.xlu1 %v568_v37, %s871_s18 }
 0x27e   : > { %577 = vrot.lane.b32.xlu1 %v575_v38, %s871_s18  ;;  %s583_s18 = scalar_lea.sflag [#allocation7], %s289_s23 }
 0x2e3   : > { %v438_v40 = vpop.permute.xlu0 %437 }
 0x2e4   : > { %v432_v41 = vpop.permute.xlu1 %431  ;;  %440 = vst.msk [vmem:[#allocation5 + $0x8] sm:$0xf] %vm427_vm10, %v438_v40 }
 0x2e5   : > { %434 = vst.msk [vmem:[#allocation5 + $0x4] sm:$0xf] %vm427_vm10, %v432_v41 }
 0x2eb   : > { %v783_v43 = vld [vmem:[#allocation5 + $0x8] ss:$0 sps:$4 sm:$0xff]  }
 0x2ec   : > { %v782_v42 = vld [vmem:[#allocation5] sm:$0xff]   ;;  %v466_v44 = vsel %vm464_vm12, %v783_v43, 0 }
 0x2ed   : > { %702 = vmatpush3.bf16.msra.mxu1 %v782_v42 }
 0x2ee   : > { %703 = vmatprep.subr.bf16.mxu1 %v867_v11 }
 0x2f1   : > { %704 = vmatpush3.bf16.msra.mxu1 %v466_v44 }
 0x2f4   : > { %706 = vmatmul.mubr.msk.bf16.vlgmr.msra.gmra.mrb[0].mxu1 %vm460_vm13, %v441_v45  ;;  %v514_v53 = vpop.permute.xlu0 %513 }
 0x2f5   : > { %v449_v46 = vpop.permute.xlu1 %448  ;;  %v559_v57 = vadd.f32 %v558_v49, %v514_v53 }
 0x2f9   : > { %v571_v47 = vpop.permute.xlu1 %570 }
 0x2fa   : > { %574 = vst.msk [vmem:[#allocation2] sm:$0x3] %vm304_vm0, %v571_v47 }
 0x2fd   : > { %v578_v48 = vpop.permute.xlu1 %577 }
 0x2fe   : > { %581 = vst.msk [vmem:[#allocation3] sm:$0xf] %vm306_vm7, %v578_v48 }
 0x3c7   : > { %v502_v54 = vpop.f32.mrb[0].mxu1 }
 0x3c8   : > { %v503_v55 = vadd.f32 %v502_v54, %v449_v46  ;;  %v707_v56 = vpop.f32.mrb[1].mxu1 }
 0x3c9   : > { %v505_v58 = vpop.f32.mrb[2].mxu1 }
 0x3ca   : > { %v508_v59 = vmax.f32 %v503_v55, 0.0  ;;  %v708_v60 = vpop.f32.mrb[3].mxu1 }
 0x3cc   : > { %v564_v61 = vadd.f32 %v559_v57, %v508_v59 }
 0x3ce   : > { %v565_v62 = vmax.f32 %v564_v61, 0.0 }
 0x3d0   : > { %567 = vst.msk [vmem:[%s291_s10] sm:$0xff] %vm566_vm14, %v565_v62 }
 0x3d1   : > { %797 = shalt.err (!%p794_p5)
}
 0x3d2   : > { %s798_s22 = scalar_lea.hbm %s1021_s17, 128  ;;  %s802_s8 = scalar_lea.hbm %s1075_s7, 256 }
 0x3d3   : > { %p799_p6 = scmp.ne.s32.totalorder %s1021_s17, %s798_s22  ;;  %p803_p10 = scmp.lt.u32.totalorder %s1021_s17, %s1075_s7 }
 0x3d4   : > { %p804_p11 = scmp.lt.u32.totalorder %s802_s8, %s798_s22  ;;  %p806_p13 = scmp.lt.u32.totalorder %s798_s22, %s1021_s17 }
 0x3d5   : > { %p800_p7 = pnand %p799_p6, %p953_p4 }
 0x3d6   : > { %p805_p12 = por %p804_p11, %p803_p10 }
 0x3d7   : > { %p801_p9 = pneg %p800_p7 }
 0x3d8   : > { %p807_p0 = por %p806_p13, %p805_p12 }
 0x3da   : > { %p808_p1 = pnand %p807_p0, %p801_p9 }
 0x3dc   : > { %811 = shalt.err (!%p808_p1)
}
 0x3dd   : > { %715 = dma.vmem_to_hbm [thread:$0]  (%p953_p4), %s1023_s12, 128, %s1021_s17, %s583_s18  }
 0x3de PF: > { %p721_p2 = scmp.ge.s32.totalorder %s862_s29, 2  ;;  %s609_s16 = sand.u32 1, %s842_s24  }
 0x3df   : > { %s610_s19 = scalar_lea.sflag [#allocation7], %s609_s16 }
 0x3e0   : > { %p718_p3 = pnand %p721_p2, %p960_p8 }
 0x3e2   : > { %837 = dma.done.wait (!%p718_p3), %s610_s19, 128  }
 0x3e3   : > { %839 = vsyncadd (!%p718_p3), %s610_s19, 4294967168  ;;  %s20_s29 = sadd.s32 1, %s862_s29   ;;  %s1078_s24 = smov %s846_s25 }
 0x3e4   : > { %p17_p5 = scmp.ge.s32.totalorder %s20_s29, 4   ;;  %s1079_s25 = smov %s850_s26 }
 0x3e5   : > { %s1080_s26 = smov %s966_s14  ;;  %s1081_s27 = smov %s858_s28 }
 0x3e6   : > { %s1082_s28 = smov %s1084_s9  ;;  %19 = sbr.rel (!%p17_p5) target bundleno = 4 (0x4), region = 87 }
 0x3ed   :  { %615 = vsyncpa [#allocation7], 1 }
 0x3ee   :  { %617 = vsyncpa [#allocation7 + $0x1], 1 }

</bundles_post_ra>
